<compile_context>
chip_gen: v5e
topology: v5e:2x2
jax: 0.10.0
libtpu: 0.0.40
codegen_flags: <defaults>
</compile_context>

<pallas_src>
import functools
import math

import jax
import jax.numpy as jnp
import numpy as np
from jax.experimental import pallas as pl
from jax.experimental.pallas import tpu as pltpu

LANE = 128  # lane-dense output width


# ------------------------------ Fused kernel --------------------------------

def _fused_block_kernel(x_ref, xim_ref, sw_ref, sb_ref, iw_ref, ib_ref,
                        ew_ref, eb_ref, wq_ref, wk_ref, dw_ref, db_ref,
                        out_ref, *, T, Tx, w_max):
    # One batch element per grid step; everything below is 2-D (time, channel).
    x = x_ref[0]          # (T, Cin)
    xim = xim_ref[0]      # (T, Kt)  im2col of the "same"-padded conv input

    # --- EncoderModule._compute_shape: all windows in ONE matmul -------------
    shape = (jnp.dot(xim, sw_ref[...], preferred_element_type=jnp.float32)
             + sb_ref[...])                                          # (T, H)

    # --- EncoderModule._compute_value ----------------------------------------
    inter_value = (jnp.dot(x, iw_ref[...], preferred_element_type=jnp.float32)
                   + ib_ref[...])                                    # (T, Dv)
    extra_value = (jnp.dot(x[w_max:, :], ew_ref[...],
                           preferred_element_type=jnp.float32)
                   + eb_ref[...])                                    # (Tx, Dv)

    # --- AttentionKernel ------------------------------------------------------
    # softmax scale is pre-folded into wq_ref (parameter preprocessing).
    q = jnp.dot(shape, wq_ref[...], preferred_element_type=jnp.float32)  # (T, H)
    k = jnp.dot(shape, wk_ref[...], preferred_element_type=jnp.float32)  # (T, H)

    neg = jnp.float32(-1e30)

    # interpolation: attend to every other position (diagonal masked)
    s = jax.lax.dot_general(q, k, (((1,), (1,)), ((), ())),
                            preferred_element_type=jnp.float32)       # (T, T)
    row = jax.lax.broadcasted_iota(jnp.int32, (T, T), 0)
    col = jax.lax.broadcasted_iota(jnp.int32, (T, T), 1)
    s = jnp.where(row == col, neg, s)
    m = jnp.max(s, axis=-1, keepdims=True)
    e = jnp.exp(s - m)
    l = jnp.sum(e, axis=-1, keepdims=True)
    p = e * pl.reciprocal(l, approx=True)                             # EUP recip
    interp_v = jnp.dot(p, inter_value, preferred_element_type=jnp.float32)

    # extrapolation: causal attention over the last Tx positions
    qx = q[w_max:, :]
    kx = k[w_max:, :]
    sx = jax.lax.dot_general(qx, kx, (((1,), (1,)), ((), ())),
                             preferred_element_type=jnp.float32)      # (Tx, Tx)
    rowx = jax.lax.broadcasted_iota(jnp.int32, (Tx, Tx), 0)
    colx = jax.lax.broadcasted_iota(jnp.int32, (Tx, Tx), 1)
    sx = jnp.where(colx > rowx, neg, sx)
    mx = jnp.max(sx, axis=-1, keepdims=True)
    ex = jnp.exp(sx - mx)
    lx = jnp.sum(ex, axis=-1, keepdims=True)
    px = ex * pl.reciprocal(lx, approx=True)
    extrap_v = jnp.dot(px, extra_value, preferred_element_type=jnp.float32)

    # --- DecoderModule: one shared matmul, lane-padded (128-wide) output -----
    vcat = jnp.concatenate([interp_v, extrap_v], axis=0)              # (T+Tx, Dv)
    dec = (jnp.dot(vcat, dw_ref[...], preferred_element_type=jnp.float32)
           + db_ref[...])                                             # (T+Tx, 128)
    out_ref[0] = dec


# --------------------------------- Wrapper -----------------------------------

def adversarial_block_forward(params, data, feats, window_size):
    """Forward pass of AdversarialBlock/AttentionBlock (mask=None path).

    Returns (interp, extrap) with shapes (B, T, d_data) and (B, T-w_max, d_data).
    """
    w_max = max(window_size)
    x = jnp.concatenate([data, feats], axis=2) if feats is not None else data
    B, T, Cin = x.shape
    Tx = T - w_max

    # --- im2col of the "same"-padded conv input (glue; tiny) -----------------
    max_left = max(w // 2 for w in window_size)
    max_right = max(w // 2 - (1 - w % 2) for w in window_size)
    xpad = jnp.pad(x, ((0, 0), (max_left, max_right), (0, 0)))
    cols = []
    for w in window_size:
        base = max_left - w // 2
        for k in range(w):
            cols.append(jax.lax.slice_in_dim(xpad, base + k, base + k + T, axis=1))
    xim = jnp.concatenate(cols, axis=2)                       # (B, T, Kt)
    Kt = xim.shape[-1]

    # --- one-time parameter preprocessing (would live at init in production) -
    H = sum(wgt.shape[0] for wgt in params["shape_w"])
    sw_parts, col_off = [], 0
    for i, w in enumerate(window_size):
        W = params["shape_w"][i]                              # (d_s, Cin, w)
        d_s = W.shape[0]
        Wflat = jnp.transpose(W, (2, 1, 0)).reshape(w * Cin, d_s)
        sw_parts.append(jnp.pad(Wflat, ((0, 0), (col_off, H - col_off - d_s))))
        col_off += d_s
    sw = jnp.concatenate(sw_parts, axis=0)                    # (Kt, H) block weight
    sb = jnp.concatenate(params["shape_b"]).reshape(1, H)

    Dv = params["inter_w"].shape[0]
    iw_t = params["inter_w"].T                                # (Cin, Dv)
    ib = params["inter_b"].reshape(1, Dv)
    ew_t = params["extra_w"].T
    eb = params["extra_b"].reshape(1, Dv)

    scale = 1.0 / math.sqrt(H)
    wq_t = params["wq"].T * scale                             # scale folded in
    wk_t = params["wk"].T

    d_data = params["dec_w"].shape[0]
    dw_pad = jnp.zeros((Dv, LANE), jnp.float32).at[:, :d_data].set(params["dec_w"].T)
    db_pad = jnp.zeros((1, LANE), jnp.float32).at[:, :d_data].set(params["dec_b"])

    kernel = functools.partial(_fused_block_kernel, T=T, Tx=Tx, w_max=w_max)
    out = pl.pallas_call(
        kernel,
        out_shape=jax.ShapeDtypeStruct((B, T + Tx, LANE), jnp.float32),
        grid=(B,),
        in_specs=[
            pl.BlockSpec((1, T, Cin), lambda b: (b, 0, 0)),   # x
            pl.BlockSpec((1, T, Kt), lambda b: (b, 0, 0)),    # im2col(x)
            pl.BlockSpec((Kt, H), lambda b: (0, 0)),          # conv weight (flat)
            pl.BlockSpec((1, H), lambda b: (0, 0)),           # conv bias
            pl.BlockSpec((Cin, Dv), lambda b: (0, 0)),        # inter weight^T
            pl.BlockSpec((1, Dv), lambda b: (0, 0)),          # inter bias
            pl.BlockSpec((Cin, Dv), lambda b: (0, 0)),        # extra weight^T
            pl.BlockSpec((1, Dv), lambda b: (0, 0)),          # extra bias
            pl.BlockSpec((H, H), lambda b: (0, 0)),           # Wq^T * scale
            pl.BlockSpec((H, H), lambda b: (0, 0)),           # Wk^T
            pl.BlockSpec((Dv, LANE), lambda b: (0, 0)),       # decoder weight^T (padded)
            pl.BlockSpec((1, LANE), lambda b: (0, 0)),        # decoder bias (padded)
        ],
        out_specs=pl.BlockSpec((1, T + Tx, LANE), lambda b: (b, 0, 0)),
        compiler_params=pltpu.CompilerParams(
            dimension_semantics=("parallel",)),               # shards over 2 TCs on v7x
    )(x, xim, sw, sb, iw_t, ib, ew_t, eb, wq_t, wk_t, dw_pad, db_pad)

    interp = out[:, :T, :d_data]
    extrap = out[:, T:, :d_data]
    return interp, extrap


# ----------------------------- Parameter setup ------------------------------

def xavier_uniform(key, shape, fan_in, fan_out):
    bound = math.sqrt(6.0 / (fan_in + fan_out))
    return jax.random.uniform(key, shape, jnp.float32, -bound, bound)


def init_params(key, d_data, d_feats, d_hidden, d_value, window_size):
    d_in = d_data + d_feats
    nw = len(window_size)
    d_shape = [d_hidden // nw] * nw
    d_shape[-1] += d_hidden % nw
    keys = jax.random.split(key, nw + 5)
    p = {}
    p["shape_w"] = [
        xavier_uniform(keys[i], (d_s, d_in, w), fan_in=d_in * w, fan_out=d_s * w)
        for i, (d_s, w) in enumerate(zip(d_shape, window_size))
    ]
    p["shape_b"] = [jnp.zeros((d_s,), jnp.float32) for d_s in d_shape]
    p["inter_w"] = xavier_uniform(keys[nw], (d_value, d_in), d_in, d_value)
    p["inter_b"] = jnp.zeros((d_value,), jnp.float32)
    p["extra_w"] = xavier_uniform(keys[nw + 1], (d_value, d_in), d_in, d_value)
    p["extra_b"] = jnp.zeros((d_value,), jnp.float32)
    p["wq"] = xavier_uniform(keys[nw + 2], (d_hidden, d_hidden), d_hidden, d_hidden)
    p["wk"] = xavier_uniform(keys[nw + 3], (d_hidden, d_hidden), d_hidden, d_hidden)
    p["dec_w"] = xavier_uniform(keys[nw + 4], (d_data, d_value), d_value, d_data)
    p["dec_b"] = jnp.zeros((d_data,), jnp.float32)
    return p


# ------------------------------ Plain-JAX reference --------------------------

def reference_forward(p, data, feats, window_size):
    w_max = max(window_size)
    x = jnp.concatenate([data, feats], axis=2)
    B, T, _ = x.shape
    shapes = []
    for i, w in enumerate(window_size):
        left = w // 2
        right = w // 2 - (1 - w % 2)
        xp = jnp.pad(x, ((0, 0), (left, right), (0, 0)))
        W = p["shape_w"][i]
        out = sum(jnp.einsum("btc,oc->bto", xp[:, k:k + T], W[:, :, k]) for k in range(w))
        shapes.append(out + p["shape_b"][i])
    shape = jnp.concatenate(shapes, axis=2)
    inter_value = x @ p["inter_w"].T + p["inter_b"]
    extra_value = x[:, w_max:] @ p["extra_w"].T + p["extra_b"]
    q = shape @ p["wq"].T
    k = shape @ p["wk"].T
    scale = 1.0 / math.sqrt(shape.shape[-1])
    s = jnp.einsum("bqh,bkh->bqk", q, k) * scale
    eye = jnp.eye(T, dtype=bool)
    inter_score = jax.nn.softmax(jnp.where(eye[None], -1e30, s), axis=-1)
    interp = jnp.einsum("bqk,bkv->bqv", inter_score, inter_value)
    qx, kx = q[:, w_max:], k[:, w_max:]
    Tx = T - w_max
    sx = jnp.einsum("bqh,bkh->bqk", qx, kx) * scale
    tri = jnp.triu(jnp.ones((Tx, Tx), bool), 1)
    extra_score = jax.nn.softmax(jnp.where(tri[None], -1e30, sx), axis=-1)
    extrap = jnp.einsum("bqk,bkv->bqv", extra_score, extra_value)
    interp = interp @ p["dec_w"].T + p["dec_b"]
    extrap = extrap @ p["dec_w"].T + p["dec_b"]
    return interp, extrap


# ----------------------------------- main ------------------------------------

if __name__ == "__main__":
    B, T = 2, 16
    d_data, d_feats, d_hidden, d_value = 4, 2, 16, 8
    window_size = (3, 5)

    root = jax.random.PRNGKey(0)
    k_data, k_feats, k_params = jax.random.split(root, 3)
    data = jax.random.normal(k_data, (B, T, d_data), jnp.float32)
    feats = jax.random.normal(k_feats, (B, T, d_feats), jnp.float32)
    params = init_params(k_params, d_data, d_feats, d_hidden, d_value, window_size)

    fwd = jax.jit(functools.partial(adversarial_block_forward, window_size=window_size))
    interp, extrap = fwd(params, data, feats)
    interp = jax.block_until_ready(interp)
    extrap = jax.block_until_ready(extrap)

    ref_interp, ref_extrap = reference_forward(params, data, feats, window_size)
    assert interp.shape == (B, T, d_data)
    assert extrap.shape == (B, T - max(window_size), d_data)
    # tolerance accommodates pl.reciprocal(approx=True) in the softmax normalizer
    np.testing.assert_allclose(np.asarray(interp), np.asarray(ref_interp),
                               rtol=5e-3, atol=5e-3)
    np.testing.assert_allclose(np.asarray(extrap), np.asarray(ref_extrap),
                               rtol=5e-3, atol=5e-3)

    print("KERNEL_OK")
</pallas_src>

<mosaic_0001>
module attributes {stable_mosaic.version = 11 : i64} {
  func.func @_fused_block_kernel(%arg0: i32, %arg1: memref<1x16x6xf32, #tpu.memory_space<vmem>>, %arg2: memref<1x16x48xf32, #tpu.memory_space<vmem>>, %arg3: memref<48x16xf32, #tpu.memory_space<vmem>>, %arg4: memref<1x16xf32, #tpu.memory_space<vmem>>, %arg5: memref<6x8xf32, #tpu.memory_space<vmem>>, %arg6: memref<1x8xf32, #tpu.memory_space<vmem>>, %arg7: memref<6x8xf32, #tpu.memory_space<vmem>>, %arg8: memref<1x8xf32, #tpu.memory_space<vmem>>, %arg9: memref<16x16xf32, #tpu.memory_space<vmem>>, %arg10: memref<16x16xf32, #tpu.memory_space<vmem>>, %arg11: memref<8x128xf32, #tpu.memory_space<vmem>>, %arg12: memref<1x128xf32, #tpu.memory_space<vmem>>, %arg13: memref<1x27x128xf32, #tpu.memory_space<vmem>>) attributes {dimension_semantics = [#tpu.dimension_semantics<parallel>], iteration_bounds = array<i64: 2>, scalar_prefetch = 0 : i64, scratch_operands = 0 : i64, tpu.core_type = #tpu.core_type<tc>, window_params = [{transform_indices = @transform_0, window_bounds = array<i64: 1, 16, 6>}, {transform_indices = @transform_1, window_bounds = array<i64: 1, 16, 48>}, {pipeline_mode = #tpu.pipeline_mode<synchronous>, transform_indices = @transform_2, window_bounds = array<i64: 48, 16>}, {pipeline_mode = #tpu.pipeline_mode<synchronous>, transform_indices = @transform_3, window_bounds = array<i64: 1, 16>}, {pipeline_mode = #tpu.pipeline_mode<synchronous>, transform_indices = @transform_4, window_bounds = array<i64: 6, 8>}, {pipeline_mode = #tpu.pipeline_mode<synchronous>, transform_indices = @transform_5, window_bounds = array<i64: 1, 8>}, {pipeline_mode = #tpu.pipeline_mode<synchronous>, transform_indices = @transform_6, window_bounds = array<i64: 6, 8>}, {pipeline_mode = #tpu.pipeline_mode<synchronous>, transform_indices = @transform_7, window_bounds = array<i64: 1, 8>}, {pipeline_mode = #tpu.pipeline_mode<synchronous>, transform_indices = @transform_8, window_bounds = array<i64: 16, 16>}, {pipeline_mode = #tpu.pipeline_mode<synchronous>, transform_indices = @transform_9, window_bounds = array<i64: 16, 16>}, {pipeline_mode = #tpu.pipeline_mode<synchronous>, transform_indices = @transform_10, window_bounds = array<i64: 8, 128>}, {pipeline_mode = #tpu.pipeline_mode<synchronous>, transform_indices = @transform_11, window_bounds = array<i64: 1, 128>}, {transform_indices = @transform_12, window_bounds = array<i64: 1, 27, 128>}]} {
    %c0 = arith.constant 0 : index
    %c0_0 = arith.constant 0 : index
    %c0_1 = arith.constant 0 : index
    %0 = vector.load %arg1[%c0, %c0_0, %c0_1] : memref<1x16x6xf32, #tpu.memory_space<vmem>>, vector<1x16x6xf32>
    %1 = vector.shape_cast %0 : vector<1x16x6xf32> to vector<16x6xf32>
    %c0_2 = arith.constant 0 : index
    %c0_3 = arith.constant 0 : index
    %c0_4 = arith.constant 0 : index
    %2 = vector.load %arg2[%c0_2, %c0_3, %c0_4] : memref<1x16x48xf32, #tpu.memory_space<vmem>>, vector<1x16x48xf32>
    %3 = vector.shape_cast %2 : vector<1x16x48xf32> to vector<16x48xf32>
    %c0_5 = arith.constant 0 : index
    %c0_6 = arith.constant 0 : index
    %4 = vector.load %arg3[%c0_5, %c0_6] : memref<48x16xf32, #tpu.memory_space<vmem>>, vector<48x16xf32>
    %cst = arith.constant dense<0.000000e+00> : vector<16x16xf32>
    %5 = tpu.matmul %3, %4, %cst {dimension_numbers = #tpu.dot_dimension_numbers<[1], [0], [0], [1], [0, 0, 1, 1], [], []>} : vector<16x48xf32>, vector<48x16xf32>, vector<16x16xf32> -> vector<16x16xf32>
    %c0_7 = arith.constant 0 : index
    %c0_8 = arith.constant 0 : index
    %6 = vector.load %arg4[%c0_7, %c0_8] : memref<1x16xf32, #tpu.memory_space<vmem>>, vector<1x16xf32>
    %7 = vector.broadcast %6 : vector<1x16xf32> to vector<16x16xf32>
    %8 = arith.addf %5, %7 : vector<16x16xf32>
    %c0_9 = arith.constant 0 : index
    %c0_10 = arith.constant 0 : index
    %9 = vector.load %arg5[%c0_9, %c0_10] : memref<6x8xf32, #tpu.memory_space<vmem>>, vector<6x8xf32>
    %cst_11 = arith.constant dense<0.000000e+00> : vector<16x8xf32>
    %10 = tpu.matmul %1, %9, %cst_11 {dimension_numbers = #tpu.dot_dimension_numbers<[1], [0], [0], [1], [0, 0, 1, 1], [], []>} : vector<16x6xf32>, vector<6x8xf32>, vector<16x8xf32> -> vector<16x8xf32>
    %c0_12 = arith.constant 0 : index
    %c0_13 = arith.constant 0 : index
    %11 = vector.load %arg6[%c0_12, %c0_13] : memref<1x8xf32, #tpu.memory_space<vmem>>, vector<1x8xf32>
    %12 = vector.broadcast %11 : vector<1x8xf32> to vector<16x8xf32>
    %13 = arith.addf %10, %12 : vector<16x8xf32>
    %14 = vector.extract_strided_slice %1 {offsets = [5, 0], sizes = [11, 6], strides = [1, 1]} : vector<16x6xf32> to vector<11x6xf32>
    %c0_14 = arith.constant 0 : index
    %c0_15 = arith.constant 0 : index
    %15 = vector.load %arg7[%c0_14, %c0_15] : memref<6x8xf32, #tpu.memory_space<vmem>>, vector<6x8xf32>
    %cst_16 = arith.constant dense<0.000000e+00> : vector<11x8xf32>
    %16 = tpu.matmul %14, %15, %cst_16 {dimension_numbers = #tpu.dot_dimension_numbers<[1], [0], [0], [1], [0, 0, 1, 1], [], []>} : vector<11x6xf32>, vector<6x8xf32>, vector<11x8xf32> -> vector<11x8xf32>
    %c0_17 = arith.constant 0 : index
    %c0_18 = arith.constant 0 : index
    %17 = vector.load %arg8[%c0_17, %c0_18] : memref<1x8xf32, #tpu.memory_space<vmem>>, vector<1x8xf32>
    %18 = vector.broadcast %17 : vector<1x8xf32> to vector<11x8xf32>
    %19 = arith.addf %16, %18 : vector<11x8xf32>
    %c0_19 = arith.constant 0 : index
    %c0_20 = arith.constant 0 : index
    %20 = vector.load %arg9[%c0_19, %c0_20] : memref<16x16xf32, #tpu.memory_space<vmem>>, vector<16x16xf32>
    %cst_21 = arith.constant dense<0.000000e+00> : vector<16x16xf32>
    %21 = tpu.matmul %8, %20, %cst_21 {dimension_numbers = #tpu.dot_dimension_numbers<[1], [0], [0], [1], [0, 0, 1, 1], [], []>} : vector<16x16xf32>, vector<16x16xf32>, vector<16x16xf32> -> vector<16x16xf32>
    %c0_22 = arith.constant 0 : index
    %c0_23 = arith.constant 0 : index
    %22 = vector.load %arg10[%c0_22, %c0_23] : memref<16x16xf32, #tpu.memory_space<vmem>>, vector<16x16xf32>
    %cst_24 = arith.constant dense<0.000000e+00> : vector<16x16xf32>
    %23 = tpu.matmul %8, %22, %cst_24 {dimension_numbers = #tpu.dot_dimension_numbers<[1], [0], [0], [1], [0, 0, 1, 1], [], []>} : vector<16x16xf32>, vector<16x16xf32>, vector<16x16xf32> -> vector<16x16xf32>
    %cst_25 = arith.constant dense<0.000000e+00> : vector<16x16xf32>
    %24 = tpu.matmul %21, %23, %cst_25 {dimension_numbers = #tpu.dot_dimension_numbers<[1], [1], [0], [0], [0, 0, 1, 0], [], []>} : vector<16x16xf32>, vector<16x16xf32>, vector<16x16xf32> -> vector<16x16xf32>
    %25 = tpu.iota {dimensions = array<i32: 0>} : vector<16x16xi32>
    %26 = tpu.iota {dimensions = array<i32: 1>} : vector<16x16xi32>
    %27 = arith.cmpi eq, %25, %26 : vector<16x16xi32>
    %cst_26 = arith.constant -1.000000e+30 : f32
    %28 = vector.broadcast %cst_26 : f32 to vector<16x16xf32>
    %29 = arith.select %27, %28, %24 : vector<16x16xi1>, vector<16x16xf32>
    %cst_27 = arith.constant dense<0xFF800000> : vector<16xf32>
    %30 = vector.multi_reduction <maximumf>, %29, %cst_27 [1] : vector<16x16xf32> to vector<16xf32>
    %31 = vector.shape_cast %30 : vector<16xf32> to vector<16x1xf32>
    %32 = vector.broadcast %31 : vector<16x1xf32> to vector<16x16xf32>
    %33 = arith.subf %29, %32 : vector<16x16xf32>
    %34 = math.exp %33 : vector<16x16xf32>
    %cst_28 = arith.constant dense<0.000000e+00> : vector<16xf32>
    %35 = vector.multi_reduction <add>, %34, %cst_28 [1] : vector<16x16xf32> to vector<16xf32>
    %36 = vector.shape_cast %35 : vector<16xf32> to vector<16x1xf32>
    %37 = tpu.reciprocal %36 {approx = true} : vector<16x1xf32> -> vector<16x1xf32>
    %38 = vector.broadcast %37 : vector<16x1xf32> to vector<16x16xf32>
    %39 = arith.mulf %34, %38 : vector<16x16xf32>
    %cst_29 = arith.constant dense<0.000000e+00> : vector<16x8xf32>
    %40 = tpu.matmul %39, %13, %cst_29 {dimension_numbers = #tpu.dot_dimension_numbers<[1], [0], [0], [1], [0, 0, 1, 1], [], []>} : vector<16x16xf32>, vector<16x8xf32>, vector<16x8xf32> -> vector<16x8xf32>
    %41 = vector.extract_strided_slice %21 {offsets = [5, 0], sizes = [11, 16], strides = [1, 1]} : vector<16x16xf32> to vector<11x16xf32>
    %42 = vector.extract_strided_slice %23 {offsets = [5, 0], sizes = [11, 16], strides = [1, 1]} : vector<16x16xf32> to vector<11x16xf32>
    %cst_30 = arith.constant dense<0.000000e+00> : vector<11x11xf32>
    %43 = tpu.matmul %41, %42, %cst_30 {dimension_numbers = #tpu.dot_dimension_numbers<[1], [1], [0], [0], [0, 0, 1, 0], [], []>} : vector<11x16xf32>, vector<11x16xf32>, vector<11x11xf32> -> vector<11x11xf32>
    %44 = tpu.iota {dimensions = array<i32: 0>} : vector<11x11xi32>
    %45 = tpu.iota {dimensions = array<i32: 1>} : vector<11x11xi32>
    %46 = arith.cmpi sgt, %45, %44 : vector<11x11xi32>
    %cst_31 = arith.constant -1.000000e+30 : f32
    %47 = vector.broadcast %cst_31 : f32 to vector<11x11xf32>
    %48 = arith.select %46, %47, %43 : vector<11x11xi1>, vector<11x11xf32>
    %cst_32 = arith.constant dense<0xFF800000> : vector<11xf32>
    %49 = vector.multi_reduction <maximumf>, %48, %cst_32 [1] : vector<11x11xf32> to vector<11xf32>
    %50 = vector.shape_cast %49 : vector<11xf32> to vector<11x1xf32>
    %51 = vector.broadcast %50 : vector<11x1xf32> to vector<11x11xf32>
    %52 = arith.subf %48, %51 : vector<11x11xf32>
    %53 = math.exp %52 : vector<11x11xf32>
    %cst_33 = arith.constant dense<0.000000e+00> : vector<11xf32>
    %54 = vector.multi_reduction <add>, %53, %cst_33 [1] : vector<11x11xf32> to vector<11xf32>
    %55 = vector.shape_cast %54 : vector<11xf32> to vector<11x1xf32>
    %56 = tpu.reciprocal %55 {approx = true} : vector<11x1xf32> -> vector<11x1xf32>
    %57 = vector.broadcast %56 : vector<11x1xf32> to vector<11x11xf32>
    %58 = arith.mulf %53, %57 : vector<11x11xf32>
    %cst_34 = arith.constant dense<0.000000e+00> : vector<11x8xf32>
    %59 = tpu.matmul %58, %19, %cst_34 {dimension_numbers = #tpu.dot_dimension_numbers<[1], [0], [0], [1], [0, 0, 1, 1], [], []>} : vector<11x11xf32>, vector<11x8xf32>, vector<11x8xf32> -> vector<11x8xf32>
    %60 = tpu.concatenate %40, %59 in 0 : vector<16x8xf32>, vector<11x8xf32> -> vector<27x8xf32>
    %c0_35 = arith.constant 0 : index
    %c0_36 = arith.constant 0 : index
    %61 = vector.load %arg11[%c0_35, %c0_36] : memref<8x128xf32, #tpu.memory_space<vmem>>, vector<8x128xf32>
    %cst_37 = arith.constant dense<0.000000e+00> : vector<27x128xf32>
    %62 = tpu.matmul %60, %61, %cst_37 {dimension_numbers = #tpu.dot_dimension_numbers<[1], [0], [0], [1], [0, 0, 1, 1], [], []>} : vector<27x8xf32>, vector<8x128xf32>, vector<27x128xf32> -> vector<27x128xf32>
    %c0_38 = arith.constant 0 : index
    %c0_39 = arith.constant 0 : index
    %63 = vector.load %arg12[%c0_38, %c0_39] : memref<1x128xf32, #tpu.memory_space<vmem>>, vector<1x128xf32>
    %64 = vector.broadcast %63 : vector<1x128xf32> to vector<27x128xf32>
    %65 = arith.addf %62, %64 : vector<27x128xf32>
    %c0_40 = arith.constant 0 : index
    %c0_41 = arith.constant 0 : index
    %c0_42 = arith.constant 0 : index
    %66 = vector.load %arg13[%c0_40, %c0_41, %c0_42] : memref<1x27x128xf32, #tpu.memory_space<vmem>>, vector<1x27x128xf32>
    %67 = vector.shape_cast %66 : vector<1x27x128xf32> to vector<27x128xf32>
    %68 = vector.shape_cast %65 : vector<27x128xf32> to vector<1x27x128xf32>
    tpu.vector_store %arg13[%c0_40, %c0_41, %c0_42], %68 {strides = array<i32>} : memref<1x27x128xf32, #tpu.memory_space<vmem>>, vector<1x27x128xf32>,
    return
  }
  func.func @transform_0(%arg0: i32) -> (i32, i32, i32) {
    %c0_i32 = arith.constant 0 : i32
    %c0_i32_0 = arith.constant 0 : i32
    %c0_i32_1 = arith.constant 0 : i32
    return %arg0, %c0_i32, %c0_i32_0 : i32, i32, i32
  }
  func.func @transform_1(%arg0: i32) -> (i32, i32, i32) {
    %c0_i32 = arith.constant 0 : i32
    %c0_i32_0 = arith.constant 0 : i32
    %c0_i32_1 = arith.constant 0 : i32
    return %arg0, %c0_i32, %c0_i32_0 : i32, i32, i32
  }
  func.func @transform_2(%arg0: i32) -> (i32, i32) {
    %c0_i32 = arith.constant 0 : i32
    %c0_i32_0 = arith.constant 0 : i32
    %c0_i32_1 = arith.constant 0 : i32
    return %c0_i32, %c0_i32_0 : i32, i32
  }
  func.func @transform_3(%arg0: i32) -> (i32, i32) {
    %c0_i32 = arith.constant 0 : i32
    %c0_i32_0 = arith.constant 0 : i32
    %c0_i32_1 = arith.constant 0 : i32
    return %c0_i32, %c0_i32_0 : i32, i32
  }
  func.func @transform_4(%arg0: i32) -> (i32, i32) {
    %c0_i32 = arith.constant 0 : i32
    %c0_i32_0 = arith.constant 0 : i32
    %c0_i32_1 = arith.constant 0 : i32
    return %c0_i32, %c0_i32_0 : i32, i32
  }
  func.func @transform_5(%arg0: i32) -> (i32, i32) {
    %c0_i32 = arith.constant 0 : i32
    %c0_i32_0 = arith.constant 0 : i32
    %c0_i32_1 = arith.constant 0 : i32
    return %c0_i32, %c0_i32_0 : i32, i32
  }
  func.func @transform_6(%arg0: i32) -> (i32, i32) {
    %c0_i32 = arith.constant 0 : i32
    %c0_i32_0 = arith.constant 0 : i32
    %c0_i32_1 = arith.constant 0 : i32
    return %c0_i32, %c0_i32_0 : i32, i32
  }
  func.func @transform_7(%arg0: i32) -> (i32, i32) {
    %c0_i32 = arith.constant 0 : i32
    %c0_i32_0 = arith.constant 0 : i32
    %c0_i32_1 = arith.constant 0 : i32
    return %c0_i32, %c0_i32_0 : i32, i32
  }
  func.func @transform_8(%arg0: i32) -> (i32, i32) {
    %c0_i32 = arith.constant 0 : i32
    %c0_i32_0 = arith.constant 0 : i32
    %c0_i32_1 = arith.constant 0 : i32
    return %c0_i32, %c0_i32_0 : i32, i32
  }
  func.func @transform_9(%arg0: i32) -> (i32, i32) {
    %c0_i32 = arith.constant 0 : i32
    %c0_i32_0 = arith.constant 0 : i32
    %c0_i32_1 = arith.constant 0 : i32
    return %c0_i32, %c0_i32_0 : i32, i32
  }
  func.func @transform_10(%arg0: i32) -> (i32, i32) {
    %c0_i32 = arith.constant 0 : i32
    %c0_i32_0 = arith.constant 0 : i32
    %c0_i32_1 = arith.constant 0 : i32
    return %c0_i32, %c0_i32_0 : i32, i32
  }
  func.func @transform_11(%arg0: i32) -> (i32, i32) {
    %c0_i32 = arith.constant 0 : i32
    %c0_i32_0 = arith.constant 0 : i32
    %c0_i32_1 = arith.constant 0 : i32
    return %c0_i32, %c0_i32_0 : i32, i32
  }
  func.func @transform_12(%arg0: i32) -> (i32, i32, i32) {
    %c0_i32 = arith.constant 0 : i32
    %c0_i32_0 = arith.constant 0 : i32
    %c0_i32_1 = arith.constant 0 : i32
    return %arg0, %c0_i32, %c0_i32_0 : i32, i32, i32
  }
}

</mosaic_0001>

<bundles_post_ra>
// kernel: adversarial_block_forward.1
= control target key start
LH: loop header
LB: loop body
LE: loop exit
PB: predicated region body
PF: predicated region fallthrough
CT: control target
= control target key end

     0   :  { %s1069_s21 = smov 0   ;;  %s1178_s0 = inlined_call_operand.vmem [shape: f32[2,16,6], index: 0, kind: input, shape index: {}]   ;;  %s1179_s1 = inlined_call_operand.vmem [shape: f32[2,16,48], index: 1, kind: input, shape index: {}]   ;;  %s1180_s2 = inlined_call_operand.vmem [shape: f32[48,16], index: 2, kind: input, shape index: {}]   ;;  %s1181_s3 = inlined_call_operand.vmem [shape: f32[1,16], index: 3, kind: input, shape index: {}]   ;;  %s1182_s4 = inlined_call_operand.vmem [shape: f32[6,8], index: 4, kind: input, shape index: {}]   ;;  %s1183_s5 = inlined_call_operand.vmem [shape: f32[1,8], index: 5, kind: input, shape index: {}]   ;;  %s1184_s6 = inlined_call_operand.vmem [shape: f32[6,8], index: 6, kind: input, shape index: {}]   ;;  %s1185_s7 = inlined_call_operand.vmem [shape: f32[1,8], index: 7, kind: input, shape index: {}]   ;;  %s1186_s8 = inlined_call_operand.vmem [shape: f32[16,16], index: 8, kind: input, shape index: {}]   ;;  %s1187_s9 = inlined_call_operand.vmem [shape: f32[16,16], index: 9, kind: input, shape index: {}]   ;;  %s1188_s10 = inlined_call_operand.vmem [shape: f32[8,128], index: 10, kind: input, shape index: {}]   ;;  %s1189_s11 = inlined_call_operand.vmem [shape: f32[1,128], index: 11, kind: input, shape index: {}]   ;;  %s1190_s12 = inlined_call_operand.vmem [shape: f32[2,27,128], index: 12, kind: output, shape index: {}]  }
   0x1 LB: > { %s923_s22 = sadd.s32 4294967295, %s1002_s21   ;;  %p927_p0 = scmp.ge.s32.totalorder %s1002_s21, 1  ;;  %s1002_s21 = sphi %s1069_s21, %s22_s21  }
   0x2   : > { %p372_p1 = scmp.lt.s32.totalorder %s1002_s21, 3 }
   0x4   : > { %p373_p2 = pnand %p927_p0, %p372_p1 }
   0x5   : > { %p419_p3 = scmp.lt.s32.totalorder (!%p373_p2), %s923_s22, 1 }
   0x6   : > { %376 = sbr.rel (%p373_p2) target bundleno = 970 (0x3ca), region = 68 }
   0xb   : > { %v443_v0 = vld [vmem:[%s1180_s2 + $0x28] sm:$0xff]  ;;  %v442_v1 = vld [vmem:[%s1180_s2 + $0x20] sm:$0xff]  ;;  %vm490_vm0 = vcmask 1045504   ;;  %v441_v2 = vld [vmem:[%s1180_s2 + $0x18] sm:$0xff]  ;;  %s1192_s22 = smov (!%p419_p3, %s923_s22), 1  ;;  %vm483_vm1 = vcmask 48128   ;;  %v648_v39 = vlaneseq }
   0xc   : > { %465 = vmatpush.msra.mxu0 %v443_v0  ;;  %v478_v3 = vld [vmem:[%s1182_s4] sm:$0x3f]  ;;  %v589_v4 = vld [vmem:[%s1187_s9 + $0x8] sm:$0xff]  ;;  %v440_v5 = vld [vmem:[%s1180_s2 + $0x10] sm:$0xff]  ;;  %s965_s17 = sshll.u32 %s1192_s22, 4  ;;  %vm448_vm2 = vcmask 392192  }
   0xd   : > { %936 = vmatpush.msk.msra.mxu1 %vm490_vm0, %v478_v3  ;;  %s423_s20 = scalar_lea.vmem %s1178_s0, %s965_s17  ;;  %v439_v6 = vld [vmem:[%s1180_s2 + $0x8] sm:$0xff]  ;;  %s428_s27 = scalar_lea.vmem %s1179_s1, %s965_s17  ;;  %v438_v8 = vld [vmem:[%s1180_s2] sm:$0xff]  ;;  %vm558_vm3 = vcmask 130048   ;;  %vm522_vm4 = vcmask 1042432   ;;  %v649_v40 = vshrl.u32 %v648_v39, 7  ;;  %v652_v41 = vand.u32 127, %v648_v39 }
   0xe   : > { %466 = vmatpush.msra.mxu0 %v442_v1  ;;  %v434_v7 = vld [vmem:[%s423_s20] sm:$0xff]  ;;  %v435_v10 = vld [vmem:[%s423_s20 + $0x8] sm:$0xff]  ;;  %vm749_vm6 = vcmask 89088   ;;  %vm753_vm9 = vcmask 83968   ;;  %vm810_vm11 = vcmask 64512   ;;  %s967_s30 = sshll.u32 %s1192_s22, 5 }
   0xf   : > { %604 = vmatpush.msrb.mxu1 %v589_v4  ;;  %v436_v9 = vld [vmem:[%s428_s27] sm:$0xff]  ;;  %v437_v11 = vld [vmem:[%s428_s27 + $0x8] sm:$0xff]  ;;  %v523_v35 = vrot.slane %v434_v7, 5  ;;  %v524_v36 = vrot.slane %v435_v10, 5  ;;  %vm745_vm5 = vcmp.gt.s32.totalorder %v652_v41, %v649_v40  ;;  %vm653_vm7 = vcmp.eq.s32.totalorder %v649_v40, %v652_v41  ;;  %s433_s17 = scalar_lea.vmem %s1190_s12, %s967_s30 }
  0x10   : > { %467 = vmatpush.msra.mxu0 %v441_v2  ;;  %937 = vmatmul.msk.f32.vlgmr.msra.gmra.mxu1 %vm483_vm1, %v434_v7  ;;  %v557_v12 = vld [vmem:[%s1186_s8 + $0x8] sm:$0xff]  ;;  %v556_v13 = vld [vmem:[%s1186_s8] sm:$0xff]  ;;  %v650_v45 = vadd.s32 8, %v649_v40 }
  0x11   : > { %579 = vmatpush.msra.mxu3 %v557_v12  ;;  %v588_v14 = vld [vmem:[%s1187_s9] sm:$0xff]  ;;  %v525_v38 = vsel %vm522_vm4, %v523_v35, %v524_v36 }
  0x12   : > { %468 = vmatpush.msra.mxu0 %v440_v5  ;;  %605 = vmatpush.msrb.mxu1 %v588_v14  ;;  %v976_v15 = vld [vmem:[%s1181_s3] ss:$0 sm:$0xff]  ;;  %vm746_vm8 = vcmp.gt.s32.totalorder %v652_v41, %v650_v45  ;;  %vm654_vm10 = vcmp.eq.s32.totalorder %v650_v45, %v652_v41 }
  0x13   : > { %580 = vmatpush.msra.mxu3 %v556_v13  ;;  %v977_v26 = vld [vmem:[%s1183_s5] ss:$0 sm:$0xff] }
  0x14   : > { %469 = vmatpush.msra.mxu0 %v439_v6  ;;  %v517_v37 = vld [vmem:[%s1184_s6] sm:$0x3f] }
  0x15   : > { %939 = vmatpush.msk.msra.mxu2 %vm490_vm0, %v517_v37  ;;  %v978_v12 = vld [vmem:[%s1185_s7] ss:$0 sm:$0xff] }
  0x16   : > { %470 = vmatpush.msra.mxu0 %v438_v8  ;;  %940 = vmatmul.msk.f32.vlgmr.msra.gmra.mxu2 %vm483_vm1, %v525_v38 }
  0x17   : > { %934 = vmatmul.msk.f32.vlgmr.msra.gmra.mxu0 %vm448_vm2, %v436_v9 }
  0x18   : > { %938 = vmatmul.msk.f32.gmra.mxu1 %vm483_vm1, %v435_v10 }
  0x1e   : > { %941 = vmatmul.msk.f32.gmra.mxu2 %vm483_vm1, %v524_v36 }
  0x1f   : > { %935 = vmatmul.msk.f32.gmra.mxu0 %vm448_vm2, %v437_v11 }
  0x8d   : > { %v511_v20 = vpop.f32.mrf.mxu1 }
  0x8e   : > { %v512_v31 = vadd.f32 %v977_v26, %v511_v20 }
  0x94   : > { %v472_v16 = vpop.f32.mrf.mxu0 }
  0x95   : > { %v473_v17 = vadd.f32 %v976_v15, %v472_v16  ;;  %v514_v21 = vpop.f32.mrf.mxu1 }
  0x96   : > { %v515_v27 = vadd.f32 %v977_v26, %v514_v21 }
  0x97   : > { %942 = vmatmul.msk.f32.vlgmr.msra.gmra.mxu3 %vm558_vm3, %v473_v17  ;;  %944 = vmatmul.msk.f32.vlgmr.msrb.gmra.mxu1 %vm558_vm3, %v473_v17 }
  0x99   : > { %v550_v11 = vpop.f32.mrf.mxu2 }
  0x9a   : > { %v551_v14 = vadd.f32 %v978_v12, %v550_v11 }
  0x9c   : > { %v475_v18 = vpop.f32.mrf.mxu0 }
  0x9d   : > { %v476_v19 = vadd.f32 %v976_v15, %v475_v18 }
  0x9f   : > { %943 = vmatmul.msk.f32.gmra.mxu3 %vm558_vm3, %v476_v19  ;;  %945 = vmatmul.msk.f32.gmra.mxu1 %vm558_vm3, %v476_v19 }
  0xa1   : > { %v553_v13 = vpop.f32.mrf.mxu2 }
  0xa2   : > { %v554_v15 = vadd.f32 %v978_v12, %v553_v13 }
  0xa4   : > { %956 = vmatpush.msk.msra.mxu1 %vm522_vm4, %v554_v15 }
  0xa6   : > { %797 = vmatpush.msra.mxu1 %v551_v14 }
 0x114   : > { %v607_v22 = vpop.f32.mrf.mxu1 }
 0x115   : > { %v711_v28 = vrot.slane %v607_v22, 5 }
 0x11a   : > { %v582_v23 = vpop.f32.mrf.mxu3 }
 0x11b   : > { %v708_v32 = vrot.slane %v582_v23, 5 }
 0x11c   : > { %v610_v24 = vpop.f32.mrf.mxu1 }
 0x11d   : > { %v712_v25 = vrot.slane %v610_v24, 5  ;;  %946 = vmatpush.xpose.msk.msrb.mxu3 %vm558_vm3, %v610_v24 }
 0x11f   : > { %952 = vmatpush.xpose.msk.msrb.mxu0 %vm558_vm3, %v712_v25  ;;  %v713_v30 = vsel %vm522_vm4, %v711_v28, %v712_v25  ;;  %v805_v28 = vld [vmem:[%s1188_s10] sm:$0xff] }
 0x120   : > { %838 = vmatpush.msrb.mxu2 %v805_v28 }
 0x121   : > { %947 = vmatpush.xpose.msk.msrb.mxu3 %vm558_vm3, %v607_v22 }
 0x122   : > { %v585_v29 = vpop.f32.mrf.mxu3 }
 0x123   : > { %v709_v33 = vrot.slane %v585_v29, 5  ;;  %953 = vmatpush.xpose.msk.msrb.mxu0 %vm558_vm3, %v713_v30 }
 0x124   : > { %948 = vmatmul.msk.f32.vlgmr.msrb.gmra.mxu3 %vm558_vm3, %v582_v23 }
 0x125   : > { %699 = vmatpush.msra.mxu3 %v515_v27  ;;  %v710_v34 = vsel %vm522_vm4, %v708_v32, %v709_v33 }
 0x126   : > { %954 = vmatmul.msk.f32.vlgmr.msrb.gmra.mxu0 %vm558_vm3, %v710_v34 }
 0x127   : > { %700 = vmatpush.msra.mxu3 %v512_v31 }
 0x12c   : > { %949 = vmatmul.msk.f32.gmra.mxu3 %vm558_vm3, %v585_v29 }
 0x12e   : > { %955 = vmatmul.msk.f32.gmra.mxu0 %vm558_vm3, %v709_v33  ;;  %v979_v33 = vld [vmem:[%s1189_s11] ss:$0 sm:$0xff] }
 0x1a3   : > { %v739_v42 = vpop.f32.mrf.mxu0 }
 0x1a4   : > { %v747_v43 = vsel %vm745_vm5, -1e+30, %v739_v42 }
 0x1a5   : > { %v750_v44 = vsel %vm749_vm6, %v747_v43, -inf }
 0x1a6   : > { %751 = vmax.xlane.f32.xlu1 %v750_v44 }
 0x1a7   : > { %v642_v46 = vpop.f32.mrf.mxu3 }
 0x1a8   : > { %v655_v47 = vsel %vm653_vm7, -1e+30, %v642_v46 }
 0x1a9   : > { %v657_v48 = vsel %vm558_vm3, %v655_v47, -inf }
 0x1aa   : > { %658 = vmax.xlane.f32.xlu0 %v657_v48 }
 0x1ab   : > { %v742_v49 = vpop.f32.mrf.mxu0 }
 0x1ac   : > { %v748_v50 = vsel %vm746_vm8, -1e+30, %v742_v49 }
 0x1ad   : > { %v754_v51 = vsel %vm753_vm9, %v748_v50, -inf }
 0x1ae   : > { %755 = vmax.xlane.f32.xlu1 %v754_v51 }
 0x1af   : > { %v645_v52 = vpop.f32.mrf.mxu3 }
 0x1b0   : > { %v656_v53 = vsel %vm654_vm10, -1e+30, %v645_v52 }
 0x1b1   : > { %v660_v54 = vsel %vm558_vm3, %v656_v53, -inf }
 0x1b2   : > { %661 = vmax.xlane.f32.xlu0 %v660_v54 }
 0x219   : > { %v752_v55 = vpop.xlane.xlu1 %751 }
 0x21a   : > { %v757_v56 = vsub.f32 %v747_v43, %v752_v55 }
 0x21c   : > { %v759_v57 = vmul.f32 1.442695, %v757_v56 }
 0x21d   : > { %v659_v58 = vpop.xlane.xlu0 %658 }
 0x21e   : > { %980 = vpow2.f32 %v759_v57  ;;  %v663_v59 = vsub.f32 %v655_v47, %v659_v58 }
 0x220   : > { %v665_v60 = vmul.f32 1.442695, %v663_v59 }
 0x221   : > { %v756_v61 = vpop.xlane.xlu1 %755 }
 0x222   : > { %982 = vpow2.f32 %v665_v60  ;;  %v758_v62 = vsub.f32 %v748_v50, %v756_v61 }
 0x224   : > { %v981_v63 = vpop.eup %980  ;;  %v761_v0 = vmul.f32 1.442695, %v758_v62 }
 0x225   : > { %v662_v1 = vpop.xlane.xlu0 %661  ;;  %v763_v2 = vsel %vm749_vm6, %v981_v63, 0.0 }
 0x226   : > { %984 = vpow2.f32 %v761_v0  ;;  %v664_v3 = vsub.f32 %v656_v53, %v662_v1  ;;  %764 = vadd.xlane.f32.xlu0 %v763_v2 }
 0x228   : > { %v983_v4 = vpop.eup %982  ;;  %v667_v5 = vmul.f32 1.442695, %v664_v3 }
 0x229   : > { %v669_v6 = vsel %vm558_vm3, %v983_v4, 0.0 }
 0x22a   : > { %986 = vpow2.f32 %v667_v5  ;;  %670 = vadd.xlane.f32.xlu2 %v669_v6 }
 0x22c   : > { %v985_v7 = vpop.eup %984 }
 0x22d   : > { %v766_v8 = vsel %vm753_vm9, %v985_v7, 0.0 }
 0x22e   : > { %767 = vadd.xlane.f32.xlu1 %v766_v8 }
 0x230   : > { %v987_v9 = vpop.eup %986 }
 0x231   : > { %v672_v10 = vsel %vm558_vm3, %v987_v9, 0.0 }
 0x232   : > { %673 = vadd.xlane.f32.xlu2 %v672_v10 }
 0x299   : > { %v765_v16 = vpop.xlane.xlu0 %764 }
 0x29a   : > { %988 = vrcp.f32 %v765_v16 }
 0x29d   : > { %v671_v17 = vpop.xlane.xlu2 %670 }
 0x29e   : > { %990 = vrcp.f32 %v671_v17 }
 0x2a0   : > { %v989_v18 = vpop.eup %988 }
 0x2a1   : > { %v771_v19 = vmul.f32 %v989_v18, %v981_v63  ;;  %v768_v20 = vpop.xlane.xlu1 %767 }
 0x2a2   : > { %992 = vrcp.f32 %v768_v20 }
 0x2a3   : > { %957 = vmatmul.msk.f32.vlgmr.msra.gmra.mxu1 %vm749_vm6, %v771_v19 }
 0x2a4   : > { %v991_v21 = vpop.eup %990 }
 0x2a5   : > { %v677_v22 = vmul.f32 %v991_v21, %v983_v4  ;;  %v674_v23 = vpop.xlane.xlu2 %673 }
 0x2a6   : > { %994 = vrcp.f32 %v674_v23 }
 0x2a7   : > { %950 = vmatmul.msk.f32.vlgmr.msra.gmra.mxu3 %vm558_vm3, %v677_v22 }
 0x2a8   : > { %v993_v24 = vpop.eup %992 }
 0x2a9   : > { %v772_v25 = vmul.f32 %v993_v24, %v985_v7 }
 0x2ab   : > { %958 = vmatmul.msk.f32.gmra.mxu1 %vm749_vm6, %v772_v25 }
 0x2ac   : > { %v995_v26 = vpop.eup %994 }
 0x2ad   : > { %v678_v27 = vmul.f32 %v995_v26, %v987_v9 }
 0x2af   : > { %951 = vmatmul.msk.f32.gmra.mxu3 %vm558_vm3, %v678_v27 }
 0x320   : > { %v799_v31 = vpop.f32.mrf.mxu1 }
 0x328   : > { %v802_v32 = vpop.f32.mrf.mxu1 }
 0x32a   : > { %v702_v29 = vpop.f32.mrf.mxu3 }
 0x32b   : > { %959 = vmatmul.msk.f32.vlgmr.msrb.gmra.mxu2 %vm810_vm11, %v702_v29 }
 0x332   : > { %v705_v30 = vpop.f32.mrf.mxu3 }
 0x333   : > { %960 = vmatmul.msk.f32.gmra.mxu2 %vm810_vm11, %v705_v30 }
 0x33b   : > { %961 = vmatmul.msk.f32.gmra.mxu2 %vm810_vm11, %v799_v31 }
 0x343   : > { %962 = vmatmul.msk.f32.gmra.mxu2 %vm810_vm11, %v802_v32 }
 0x3ae   : > { %v840_v34 = vpop.f32.mrf.mxu2 }
 0x3af   : > { %v841_v35 = vadd.f32 %v979_v33, %v840_v34 }
 0x3b1   : > { %852 = vst [vmem:[%s433_s17] sm:$0xff] %v841_v35 }
 0x3b6   : > { %v843_v36 = vpop.f32.mrf.mxu2 }
 0x3b7   : > { %v844_v37 = vadd.f32 %v979_v33, %v843_v36 }
 0x3b9   : > { %853 = vst [vmem:[%s433_s17 + $0x8] sm:$0xff] %v844_v37 }
 0x3be   : > { %v846_v38 = vpop.f32.mrf.mxu2 }
 0x3bf   : > { %v847_v39 = vadd.f32 %v979_v33, %v846_v38 }
 0x3c1   : > { %854 = vst [vmem:[%s433_s17 + $0x10] sm:$0xff] %v847_v39 }
 0x3c6   : > { %v849_v40 = vpop.f32.mrf.mxu2 }
 0x3c7   : > { %v850_v41 = vadd.f32 %v979_v33, %v849_v40 }
 0x3c9   : > { %855 = vst [vmem:[%s433_s17 + $0x18] sm:$0x7] %v850_v41 }
 0x3ca PF: > { %s22_s21 = sadd.s32 1, %s1002_s21  }
 0x3cb   : > { %p19_p4 = scmp.ge.s32.totalorder %s22_s21, 4  }
 0x3cd   :  { %21 = sbr.rel (!%p19_p4) target bundleno = 1 (0x1), region = 101 }

</bundles_post_ra>
